<compile_context>
chip_gen: v7x
topology: tpu7x:2x2x1
jax: 0.10.0
libtpu: 0.0.40
codegen_flags: <defaults>
</compile_context>

<pallas_src>
import jax
import jax.numpy as jnp
from jax.experimental import pallas as pl
from jax.experimental.pallas import tpu as pltpu


def posup_kernel(y_ref, w_ref, b_ref, out_ref):
    # y_ref:   (tm, 2)     VMEM  flattened input tile (lane-padded internally)
    # w_ref:   (2, 1024)   VMEM  collapsed weight, resident across the grid
    # b_ref:   (1, 1024)   VMEM  collapsed bias, resident across the grid
    # out_ref: (tm, 1024)  VMEM  lane-dense output tile (1024 % 128 == 0)
    y0 = y_ref[:, 0:1]                        # (tm, 1)   sublane vector
    y1 = y_ref[:, 1:2]                        # (tm, 1)
    w0 = w_ref[0:1, :]                        # (1, 1024) lane vector
    w1 = w_ref[1:2, :]                        # (1, 1024)
    out = y0 * w0 + y1 * w1 + b_ref[...]      # pure VPU broadcast FMAs
    out_ref[...] = out.astype(out_ref.dtype)


def _batch_tile(B, block_b):
    """Sublane-aligned batch tile.

    Tiny batches use one full-extent block (always legal).  Larger batches are
    split into >= 2 tiles so the 'parallel' batch axis can shard across both
    v7x TensorCores, capped at block_b rows per tile.
    """
    if B <= 16:
        return B
    half = -(-B // 2)                       # cdiv(B, 2)
    half_aligned = ((half + 7) // 8) * 8    # sublane-align
    return min(block_b, half_aligned)


def posup_forward(y, w1, b1, w2, b2, *, block_b=2048, out_dtype=jnp.float32):
    """PosUp forward.

    y : any shape with an even element count (torch does reshape(-1,1,2)
        .view(B,-1), i.e. a row-major flatten to (B, 2)).
    w1: (2, 256)    fc1 weight, transposed from torch's (256, 2) layout.
    b1: (256,)
    w2: (256, 1024) fc2 weight, transposed from torch's (1024, 256) layout.
    b2: (1024,)
    returns (B, 1024) in out_dtype (f32 by default, matching the torch module).
    """
    in1, hid = w1.shape          # (2, 256)
    hid2, out_dim = w2.shape     # (256, 1024)
    assert hid == hid2 and in1 == 2

    # Collapse the two bias-only linears into one affine map.  Done in HIGHEST
    # precision so it tracks a true-f32 two-matmul reference; cost is a
    # one-off ~0.5 MFLOP.  (In production, precompute once outside the step.)
    w1f = w1.astype(jnp.float32)
    w2f = w2.astype(jnp.float32)
    W = jnp.dot(w1f, w2f, precision=jax.lax.Precision.HIGHEST)          # (2, 1024)
    b = (jnp.dot(b1.astype(jnp.float32).reshape(1, hid), w2f,
                 precision=jax.lax.Precision.HIGHEST)
         + b2.astype(jnp.float32).reshape(1, out_dim))                  # (1, 1024)

    # torch: y.reshape(-1,1,2).view(B,-1)  ==  row-major reshape to (B, 2).
    y2 = y.reshape(-1, in1).astype(jnp.float32)
    B = y2.shape[0]

    tm = _batch_tile(B, block_b)
    grid = (pl.cdiv(B, tm),)

    out_itemsize = jnp.dtype(out_dtype).itemsize
    # y tile is lane-padded to (tm, 128) f32 in VMEM; in/out are double-buffered.
    vmem_need = (2 * tm * 128 * 4                      # y tiles (padded)
                 + 2 * tm * out_dim * out_itemsize     # out tiles
                 + 2 * 4 * (W.size + b.size)           # resident params
                 + (1 << 20))                          # slack
    vmem_limit = min(max(vmem_need, 16 << 20), 48 << 20)

    flops = 4 * B * out_dim                            # 2 FMAs + 1 add / element
    bytes_accessed = (4 * y2.size + 4 * W.size + 4 * b.size
                      + out_itemsize * B * out_dim)

    return pl.pallas_call(
        posup_kernel,
        out_shape=jax.ShapeDtypeStruct((B, out_dim), out_dtype),
        grid_spec=pltpu.PrefetchScalarGridSpec(
            num_scalar_prefetch=0,
            grid=grid,
            in_specs=[
                pl.BlockSpec((tm, in1), lambda i: (i, 0)),        # y tile
                pl.BlockSpec((in1, out_dim), lambda i: (0, 0)),   # W (resident)
                pl.BlockSpec((1, out_dim), lambda i: (0, 0)),     # b (resident)
            ],
            out_specs=pl.BlockSpec((tm, out_dim), lambda i: (i, 0)),
        ),
        compiler_params=pltpu.CompilerParams(
            dimension_semantics=("parallel",),
            vmem_limit_bytes=vmem_limit),
        cost_estimate=pl.CostEstimate(
            flops=flops, transcendentals=0, bytes_accessed=bytes_accessed),
    )(y2, W, b)


if __name__ == "__main__":
    key = jax.random.PRNGKey(0)
    ks = jax.random.split(key, 5)

    # Parameters.  torch.nn.Linear stores weight as (out, in); we keep (in, out)
    # so x @ W + b is direct.  Init mimics torch's U(-1/sqrt(fan_in), 1/sqrt(fan_in)).
    lim1 = 1.0 / (2.0 ** 0.5)
    w1 = jax.random.uniform(ks[1], (2, 256), jnp.float32, -lim1, lim1)
    b1 = jax.random.uniform(ks[2], (256,), jnp.float32, -lim1, lim1)
    lim2 = 1.0 / (256.0 ** 0.5)
    w2 = jax.random.uniform(ks[3], (256, 1024), jnp.float32, -lim2, lim2)
    b2 = jax.random.uniform(ks[4], (1024,), jnp.float32, -lim2, lim2)

    fwd = jax.jit(posup_forward)

    def ref_fwd(yy):
        # Pure-JAX two-matmul reference (original module structure), near-f32.
        h = jnp.dot(yy.reshape(-1, 2), w1,
                    precision=jax.lax.Precision.HIGHEST) + b1
        return jnp.dot(h, w2, precision=jax.lax.Precision.HIGHEST) + b2

    # 1) Tiny batch matching the module's intended use (B = 2 points).
    y_small = jax.random.normal(ks[0], (2, 2), jnp.float32)
    out_small = fwd(y_small, w1, b1, w2, b2)
    jax.block_until_ready(out_small)
    assert out_small.shape == (2, 1024) and out_small.dtype == jnp.float32
    assert jnp.allclose(out_small, ref_fwd(y_small), atol=1e-4, rtol=1e-4)

    # 2) Larger batch: exercises the 2-step "parallel" grid and the masked
    #    ragged last block (B=100 -> tm=56, grid=(2,)).
    y_big = jax.random.normal(ks[0], (100, 2), jnp.float32)
    out_big = fwd(y_big, w1, b1, w2, b2)
    jax.block_until_ready(out_big)
    assert out_big.shape == (100, 1024)
    assert jnp.allclose(out_big, ref_fwd(y_big), atol=1e-4, rtol=1e-4)

    print("KERNEL_OK")
</pallas_src>

<mosaic_0001>
module attributes {stable_mosaic.version = 11 : i64} {
  func.func @posup_kernel(%arg0: i32, %arg1: memref<2x2xf32, #tpu.memory_space<vmem>>, %arg2: memref<2x1024xf32, #tpu.memory_space<vmem>>, %arg3: memref<1x1024xf32, #tpu.memory_space<vmem>>, %arg4: memref<2x1024xf32, #tpu.memory_space<vmem>>) attributes {dimension_semantics = [#tpu.dimension_semantics<parallel>], iteration_bounds = array<i64: 1>, scalar_prefetch = 0 : i64, scratch_operands = 0 : i64, tpu.core_type = #tpu.core_type<tc>, window_params = [{transform_indices = @transform_0, window_bounds = array<i64: 2, 2>}, {pipeline_mode = #tpu.pipeline_mode<synchronous>, transform_indices = @transform_1, window_bounds = array<i64: 2, 1024>}, {pipeline_mode = #tpu.pipeline_mode<synchronous>, transform_indices = @transform_2, window_bounds = array<i64: 1, 1024>}, {transform_indices = @transform_3, window_bounds = array<i64: 2, 1024>}]} {
    %c0 = arith.constant 0 : index
    %c0_0 = arith.constant 0 : index
    %0 = vector.load %arg1[%c0, %c0_0] : memref<2x2xf32, #tpu.memory_space<vmem>>, vector<2x1xf32>
    %c0_1 = arith.constant 0 : index
    %c1 = arith.constant 1 : index
    %1 = vector.load %arg1[%c0_1, %c1] : memref<2x2xf32, #tpu.memory_space<vmem>>, vector<2x1xf32>
    %c0_2 = arith.constant 0 : index
    %c0_3 = arith.constant 0 : index
    %2 = vector.load %arg2[%c0_2, %c0_3] : memref<2x1024xf32, #tpu.memory_space<vmem>>, vector<1x1024xf32>
    %c1_4 = arith.constant 1 : index
    %c0_5 = arith.constant 0 : index
    %3 = vector.load %arg2[%c1_4, %c0_5] : memref<2x1024xf32, #tpu.memory_space<vmem>>, vector<1x1024xf32>
    %4 = vector.broadcast %0 : vector<2x1xf32> to vector<2x1024xf32>
    %5 = vector.broadcast %2 : vector<1x1024xf32> to vector<2x1024xf32>
    %6 = arith.mulf %4, %5 : vector<2x1024xf32>
    %7 = vector.broadcast %1 : vector<2x1xf32> to vector<2x1024xf32>
    %8 = vector.broadcast %3 : vector<1x1024xf32> to vector<2x1024xf32>
    %9 = arith.mulf %7, %8 : vector<2x1024xf32>
    %10 = arith.addf %6, %9 : vector<2x1024xf32>
    %c0_6 = arith.constant 0 : index
    %c0_7 = arith.constant 0 : index
    %11 = vector.load %arg3[%c0_6, %c0_7] : memref<1x1024xf32, #tpu.memory_space<vmem>>, vector<1x1024xf32>
    %12 = vector.broadcast %11 : vector<1x1024xf32> to vector<2x1024xf32>
    %13 = arith.addf %10, %12 : vector<2x1024xf32>
    %c0_8 = arith.constant 0 : index
    %c0_9 = arith.constant 0 : index
    %14 = vector.load %arg4[%c0_8, %c0_9] : memref<2x1024xf32, #tpu.memory_space<vmem>>, vector<2x1024xf32>
    tpu.vector_store %arg4[%c0_8, %c0_9], %13 {strides = array<i32>} : memref<2x1024xf32, #tpu.memory_space<vmem>>, vector<2x1024xf32>,
    return
  }
  func.func @transform_0(%arg0: i32) -> (i32, i32) {
    %c0_i32 = arith.constant 0 : i32
    %c0_i32_0 = arith.constant 0 : i32
    return %arg0, %c0_i32 : i32, i32
  }
  func.func @transform_1(%arg0: i32) -> (i32, i32) {
    %c0_i32 = arith.constant 0 : i32
    %c0_i32_0 = arith.constant 0 : i32
    %c0_i32_1 = arith.constant 0 : i32
    return %c0_i32, %c0_i32_0 : i32, i32
  }
  func.func @transform_2(%arg0: i32) -> (i32, i32) {
    %c0_i32 = arith.constant 0 : i32
    %c0_i32_0 = arith.constant 0 : i32
    %c0_i32_1 = arith.constant 0 : i32
    return %c0_i32, %c0_i32_0 : i32, i32
  }
  func.func @transform_3(%arg0: i32) -> (i32, i32) {
    %c0_i32 = arith.constant 0 : i32
    %c0_i32_0 = arith.constant 0 : i32
    return %arg0, %c0_i32 : i32, i32
  }
}

</mosaic_0001>

<bundles_post_ra>
// kernel: posup_forward.1
= control target key start
LH: loop header
LB: loop body
LE: loop exit
PB: predicated region body
PF: predicated region fallthrough
CT: control target
= control target key end

     0   :  { %s363_s0 = inlined_call_operand.vmem [shape: f32[2,2], index: 0, kind: input, shape index: {}]   ;;  %s364_s1 = inlined_call_operand.vmem [shape: f32[2,1024], index: 1, kind: input, shape index: {}]   ;;  %s365_s2 = inlined_call_operand.vmem [shape: f32[1,1024], index: 2, kind: input, shape index: {}]   ;;  %s366_s3 = inlined_call_operand.hbm [shape: f32[2,1024], index: 3, kind: output, shape index: {}]  }
   0x1   :  { %v15_v0 = vld [vmem:[%s363_s0] sm:$0x3] }
   0x2   :  { %8 = vsyncpa [#allocation3], 0  ;;  %v275_v1 = vmov 0   ;;  %v276_v2 = vmov 1   ;;  %v25_v3 = vlaneseq  ;;  %v16_v7 = vld [vmem:[%s364_s1] ss:$2 sm:$0xff] }
   0x3   :  { %249 = vset.pattern.permute.xlu0 %v275_v1  ;;  %v277_v14 = vmov 1983009808   ;;  %v244_v16 = vld [vmem:[%s364_s1 + $0x1] ss:$2 sm:$0xff]  ;;  %s278_s1 = smov [#allocation2]  }
   0x4   :  { %21 = vperm.xlu0 %249, %v15_v0   ;;  %v26_v4 = vshrl.u32 %v25_v3, 7  ;;  %v195_v15 = vunpack.c.l.s4 %v277_v14  ;;  %v134_v23 = vld [vmem:[%s365_s2] sm:$0xff]  ;;  %s236_s2 = sshll.u32 %s278_s1, 4  ;;  %s237_s2 = int_to_ptr.vmem [resolvable:$true] %s236_s2 }
   0x5   :  { %s251_s19 = scalar_lea.vmem %s237_s2, 256  ;;  %p256_p1 = scmp.lt.s32.totalorder %s237_s2, %s237_s2 }
   0x6   :  { %v302_v5 = vsub.s32 0, %v26_v4  ;;  %v304_v6 = vsub.s32 1, %v26_v4  ;;  %v309_v8 = vsub.s32 2, %v26_v4  ;;  %v311_v9 = vsub.s32 3, %v26_v4  ;;  %p252_p0 = scmp.ne.s32.totalorder %s237_s2, %s251_s19  ;;  %p257_p2 = scmp.lt.s32.totalorder %s251_s19, %s251_s19 }
   0x7   :  { %v313_v10 = vsub.s32 4, %v26_v4  ;;  %v315_v11 = vsub.s32 5, %v26_v4  ;;  %v317_v12 = vsub.s32 6, %v26_v4  ;;  %v319_v13 = vsub.s32 7, %v26_v4 }
   0x8   :  { %250 = vset.pattern.permute.xlu0 %v276_v2  ;;  %v28_v17 = vrot.slane %v16_v7, %v302_v5  ;;  %v32_v18 = vrot.slane %v16_v7, %v304_v6  ;;  %v36_v19 = vrot.slane %v16_v7, %v309_v8  ;;  %v40_v20 = vrot.slane %v16_v7, %v311_v9  ;;  %p258_p3 = por %p257_p2, %p256_p1 }
   0x9   :  { %74 = vperm.xlu0 %250, %v15_v0   ;;  %v44_v21 = vrot.slane %v16_v7, %v313_v10  ;;  %v48_v22 = vrot.slane %v16_v7, %v315_v11  ;;  %v52_v24 = vrot.slane %v16_v7, %v317_v12  ;;  %v56_v25 = vrot.slane %v16_v7, %v319_v13 }
   0xa   :  { %v81_v26 = vrot.slane %v244_v16, %v302_v5  ;;  %v196_v27 = vunpack.c.0.s8 %v195_v15  ;;  %v85_v29 = vrot.slane %v244_v16, %v304_v6  ;;  %v89_v30 = vrot.slane %v244_v16, %v309_v8  ;;  %p259_p4 = pnand %p258_p3, %p252_p0 }
   0xb   :  { %v93_v31 = vrot.slane %v244_v16, %v311_v9  ;;  %v97_v32 = vrot.slane %v244_v16, %v313_v10  ;;  %v101_v33 = vrot.slane %v244_v16, %v315_v11  ;;  %v105_v34 = vrot.slane %v244_v16, %v317_v12 }
   0xc   :  { %v109_v35 = vrot.slane %v244_v16, %v319_v13  ;;  %v139_v36 = vrot.slane %v134_v23, %v302_v5  ;;  %v143_v37 = vrot.slane %v134_v23, %v304_v6  ;;  %v147_v38 = vrot.slane %v134_v23, %v309_v8 }
   0xd   :  { %v151_v39 = vrot.slane %v134_v23, %v311_v9  ;;  %v155_v40 = vrot.slane %v134_v23, %v313_v10  ;;  %v159_v41 = vrot.slane %v134_v23, %v315_v11  ;;  %v163_v42 = vrot.slane %v134_v23, %v317_v12 }
   0xe   :  { %v167_v43 = vrot.slane %v134_v23, %v319_v13  ;;  %v199_v44 = vsub.s32 %v196_v27, %v26_v4 }
  0x83   :  { %v22_v28 = vpop.permute.xlu0 %21 }
  0x84   :  { %v65_v45 = vmul.f32 %v28_v17, %v22_v28  ;;  %v66_v46 = vmul.f32 %v32_v18, %v22_v28  ;;  %v67_v47 = vmul.f32 %v36_v19, %v22_v28  ;;  %v68_v48 = vmul.f32 %v40_v20, %v22_v28 }
  0x85   :  { %v69_v50 = vmul.f32 %v44_v21, %v22_v28  ;;  %v70_v51 = vmul.f32 %v48_v22, %v22_v28  ;;  %v71_v52 = vmul.f32 %v52_v24, %v22_v28  ;;  %v72_v53 = vmul.f32 %v56_v25, %v22_v28 }
  0x88   :  { %v75_v49 = vpop.permute.xlu0 %74 }
  0x89   :  { %v118_v54 = vmul.f32 %v81_v26, %v75_v49  ;;  %v119_v55 = vmul.f32 %v85_v29, %v75_v49  ;;  %v120_v56 = vmul.f32 %v89_v30, %v75_v49  ;;  %v121_v57 = vmul.f32 %v93_v31, %v75_v49 }
  0x8a   :  { %v122_v58 = vmul.f32 %v97_v32, %v75_v49  ;;  %v123_v59 = vmul.f32 %v101_v33, %v75_v49  ;;  %v124_v60 = vmul.f32 %v105_v34, %v75_v49  ;;  %v125_v61 = vmul.f32 %v109_v35, %v75_v49 }
  0x8b   :  { %v126_v62 = vadd.f32 %v118_v54, %v65_v45  ;;  %v127_v63 = vadd.f32 %v119_v55, %v66_v46  ;;  %v128_v0 = vadd.f32 %v120_v56, %v67_v47  ;;  %v129_v1 = vadd.f32 %v121_v57, %v68_v48 }
  0x8c   :  { %v130_v2 = vadd.f32 %v122_v58, %v69_v50  ;;  %v131_v3 = vadd.f32 %v123_v59, %v70_v51  ;;  %v132_v4 = vadd.f32 %v124_v60, %v71_v52  ;;  %v133_v5 = vadd.f32 %v125_v61, %v72_v53 }
  0x8d   :  { %v176_v6 = vadd.f32 %v139_v36, %v126_v62  ;;  %v177_v7 = vadd.f32 %v143_v37, %v127_v63  ;;  %v178_v8 = vadd.f32 %v147_v38, %v128_v0  ;;  %v179_v9 = vadd.f32 %v151_v39, %v129_v1 }
  0x8e   :  { %v180_v10 = vadd.f32 %v155_v40, %v130_v2  ;;  %v181_v11 = vadd.f32 %v159_v41, %v131_v3  ;;  %v182_v12 = vadd.f32 %v163_v42, %v132_v4  ;;  %v183_v13 = vadd.f32 %v167_v43, %v133_v5 }
  0x8f   :  { %v192_v14 = vcombine.low %v176_v6, %v177_v7  ;;  %v193_v15 = vcombine.low %v178_v8, %v179_v9 }
  0x90   :  { %v209_v16 = vcombine.low %v180_v10, %v181_v11  ;;  %v210_v17 = vcombine.low %v182_v12, %v183_v13 }
  0x91   :  { %v200_v18 = vrot.slane %v192_v14, %v199_v44  ;;  %v207_v19 = vrot.slane %v193_v15, %v199_v44 }
  0x92   :  { %v217_v20 = vrot.slane %v209_v16, %v199_v44  ;;  %v224_v21 = vrot.slane %v210_v17, %v199_v44 }
  0x93   :  { %v208_v22 = vcombine.low %v200_v18, %v207_v19 }
  0x94   :  { %v225_v23 = vcombine.low %v217_v20, %v224_v21 }
  0x95   :  { %228 = vst [vmem:[#allocation2] sm:$0xff] %v208_v22 }
  0x96   :  { %229 = vst [vmem:[#allocation2 + $0x8] sm:$0xff] %v225_v23 }
  0x97   :  { %262 = shalt.err (!%p259_p4)
}
  0x98   :  { %s263_s22 = scalar_lea.hbm %s366_s3, 256 }
  0x99   :  { %p264_p5 = scmp.ne.s32.totalorder %s366_s3, %s263_s22  ;;  %p267_p6 = scmp.lt.u32.totalorder %s263_s22, %s366_s3 }
  0x9b   :  { %p269_p7 = pnand %p267_p6, %p264_p5 }
  0x9d   :  { %272 = shalt.err (!%p269_p7)
}
  0x9e   :  { %239 = dma.vmem_to_hbm [thread:$0]  %s237_s2, 256, %s366_s3, [#allocation3]  }
  0x9f   :  { %273 = dma.done.wait [#allocation3], 256  }
  0xa0   :  { %274 = vsyncadd [#allocation3], 4294967040 }
  0xa1   :  { %243 = vsyncpa [#allocation3], 1 }

</bundles_post_ra>
